<compile_context>
chip_gen: v7x
topology: tpu7x:2x2x1
jax: 0.10.0
libtpu: 0.0.40
codegen_flags: <defaults>
</compile_context>

<pallas_src>
import functools

import jax
import jax.numpy as jnp
from jax.experimental import pallas as pl
from jax.experimental.pallas import tpu as pltpu


def _round_up(x, m):
    return ((x + m - 1) // m) * m


def _matmul_resident_w_kernel(x_ref, w_ref, o_ref):
    # x_ref: (tm, N)  rows of flattened Xp
    # w_ref: (N, K)   full pre-transposed weight, VMEM-resident across the grid
    # o_ref: (tm, K)  output tile (single pass, no accumulator needed)
    o_ref[...] = jnp.dot(
        x_ref[...], w_ref[...], preferred_element_type=jnp.float32
    ).astype(o_ref.dtype)


def _matmul_acc_kernel(x_ref, w_ref, o_ref, acc_ref):
    # x_ref: (tm, tk), w_ref: (tk, tn), o_ref: (tm, tn)
    # acc_ref: (tm, tn) f32 accumulator, resident across the k (reduction) axis
    @pl.when(pl.program_id(2) == 0)
    def _init():
        acc_ref[...] = jnp.zeros_like(acc_ref)

    acc_ref[...] += jnp.dot(
        x_ref[...], w_ref[...], preferred_element_type=jnp.float32
    )

    @pl.when(pl.program_id(2) == pl.num_programs(2) - 1)
    def _finalize():
        o_ref[...] = acc_ref[...].astype(o_ref.dtype)


@functools.partial(jax.jit, static_argnames=("tm", "tn", "tk"))
def solve_forward(xp, m_param, *, tm=512, tn=256, tk=512):
    """xp: (B, M, N), m_param: (K, N)  ->  (B, M, K).

    Computes Xp @ M^T == (M @ Xp^T)^T, matching Solve.forward.
    """
    B, M, N = xp.shape
    K, N2 = m_param.shape
    assert N == N2, (N, N2)

    rows = B * M
    x2d = xp.reshape(rows, N)
    w = m_param.T  # (N, K) -- transpose hoisted out of the kernel, done once.
    # TODO(synk): for repeated inference, precompute (and optionally bf16-cast)
    # this transposed weight once outside the call instead of per call.

    itemsize = jnp.dtype(xp.dtype).itemsize

    # Clamp the row tile to the problem; cover the rows with a cdiv grid so the
    # big operand is never copied/padded in HBM along the row dimension.
    tm = min(tm, _round_up(rows, 8))
    grid_m = pl.cdiv(rows, tm)

    # ---------------- Fast path: small fitted weight, VMEM-resident ---------
    w_bytes = N * K * itemsize
    fast_footprint = (
        2 * tm * N * itemsize   # double-buffered lhs tiles
        + 2 * w_bytes           # resident weight (conservatively x2)
        + 2 * tm * K * itemsize # double-buffered output tiles
    )
    if w_bytes <= (2 << 20) and fast_footprint <= (20 << 20):
        out = pl.pallas_call(
            _matmul_resident_w_kernel,
            out_shape=jax.ShapeDtypeStruct((rows, K), xp.dtype),
            grid_spec=pltpu.PrefetchScalarGridSpec(
                num_scalar_prefetch=0,
                grid=(grid_m,),
                in_specs=[
                    # lhs: one row-tile per grid step, full (unpadded) N.
                    pl.BlockSpec((tm, N), lambda i: (i, 0)),
                    # weight: constant block index -> DMA'd once, stays in VMEM.
                    pl.BlockSpec((N, K), lambda i: (0, 0)),
                ],
                out_specs=pl.BlockSpec((tm, K), lambda i: (i, 0)),
            ),
            compiler_params=pltpu.CompilerParams(
                dimension_semantics=("parallel",),
                vmem_limit_bytes=32 << 20,
            ),
        )(x2d, w)
        return out.reshape(B, M, K)

    # ---------------- General path: tiled accumulator GEMM ------------------
    tn = min(tn, _round_up(K, 128))
    tk = min(tk, _round_up(N, 128))
    Np = _round_up(N, tk)
    Kp = _round_up(K, tn)

    # Reduction padding must be exact zeros (garbage * 0 could be NaN); only
    # materialize padded copies when actually required.
    if Np != N:
        x_in = jnp.pad(x2d, ((0, 0), (0, Np - N)))
    else:
        x_in = x2d
    if (Np, Kp) != w.shape:
        w_in = jnp.zeros((Np, Kp), w.dtype).at[:N, :K].set(w)
    else:
        w_in = w

    grid = (grid_m, Kp // tn, Np // tk)

    out = pl.pallas_call(
        _matmul_acc_kernel,
        out_shape=jax.ShapeDtypeStruct((rows, Kp), xp.dtype),
        grid_spec=pltpu.PrefetchScalarGridSpec(
            num_scalar_prefetch=0,
            grid=grid,
            in_specs=[
                pl.BlockSpec((tm, tk), lambda i, j, k: (i, k)),
                pl.BlockSpec((tk, tn), lambda i, j, k: (k, j)),
            ],
            out_specs=pl.BlockSpec((tm, tn), lambda i, j, k: (i, j)),
            scratch_shapes=[pltpu.VMEM((tm, tn), jnp.float32)],
        ),
        compiler_params=pltpu.CompilerParams(
            dimension_semantics=("parallel", "parallel", "arbitrary"),
            vmem_limit_bytes=32 << 20,
        ),
    )(x_in, w_in)

    if Kp != K:
        out = out[:, :K]
    return out.reshape(B, M, K)


def fit(X, Y, l=1e-5):
    """Plain-JAX parameter setup mirroring Solve.fit (glue, not the hot path).
    X: (N, N), Y: (N, K) -> M: (K, N)."""
    N = X.shape[-2]
    A = X.T + jnp.eye(N, dtype=X.dtype) * l
    Z = jnp.linalg.solve(A, Y)  # (N, K)  ~ lu_factor + lu_solve
    return Z.T                  # (K, N)


if __name__ == "__main__":
    key = jax.random.PRNGKey(0)
    kx, ky, kp = jax.random.split(key, 3)

    B, Mrows, N, K = 2, 16, 32, 8

    # Deterministic "training" data to build the fitted parameter M.
    X = jax.random.normal(kx, (N, N), dtype=jnp.float32)
    Y = jax.random.normal(ky, (N, K), dtype=jnp.float32)
    M_param = fit(X, Y, l=1e-5)  # (K, N)

    # Forward input.
    Xp = jax.random.normal(kp, (B, Mrows, N), dtype=jnp.float32)

    out = solve_forward(Xp, M_param)
    out = jax.block_until_ready(out)

    # Reference check against the PyTorch semantics: (M @ Xp^T)^T == Xp @ M^T
    ref = jnp.einsum("bmn,kn->bmk", Xp, M_param)
    assert out.shape == (B, Mrows, K)
    assert jnp.allclose(out, ref, atol=1e-4, rtol=1e-4)

    print("KERNEL_OK")
</pallas_src>

<mosaic_0001>
module attributes {stable_mosaic.version = 11 : i64} {
  func.func @_matmul_resident_w_kernel(%arg0: i32, %arg1: memref<32x32xf32, #tpu.memory_space<vmem>>, %arg2: memref<32x8xf32, #tpu.memory_space<vmem>>, %arg3: memref<32x8xf32, #tpu.memory_space<vmem>>) attributes {dimension_semantics = [#tpu.dimension_semantics<parallel>], iteration_bounds = array<i64: 1>, scalar_prefetch = 0 : i64, scratch_operands = 0 : i64, tpu.core_type = #tpu.core_type<tc>, window_params = [{transform_indices = @transform_0, window_bounds = array<i64: 32, 32>}, {pipeline_mode = #tpu.pipeline_mode<synchronous>, transform_indices = @transform_1, window_bounds = array<i64: 32, 8>}, {transform_indices = @transform_2, window_bounds = array<i64: 32, 8>}]} {
    %c0 = arith.constant 0 : index
    %c0_0 = arith.constant 0 : index
    %0 = vector.load %arg1[%c0, %c0_0] : memref<32x32xf32, #tpu.memory_space<vmem>>, vector<32x32xf32>
    %c0_1 = arith.constant 0 : index
    %c0_2 = arith.constant 0 : index
    %1 = vector.load %arg2[%c0_1, %c0_2] : memref<32x8xf32, #tpu.memory_space<vmem>>, vector<32x8xf32>
    %cst = arith.constant dense<0.000000e+00> : vector<32x8xf32>
    %2 = tpu.matmul %0, %1, %cst {dimension_numbers = #tpu.dot_dimension_numbers<[1], [0], [0], [1], [0, 0, 1, 1], [], []>} : vector<32x32xf32>, vector<32x8xf32>, vector<32x8xf32> -> vector<32x8xf32>
    %c0_3 = arith.constant 0 : index
    %c0_4 = arith.constant 0 : index
    %3 = vector.load %arg3[%c0_3, %c0_4] : memref<32x8xf32, #tpu.memory_space<vmem>>, vector<32x8xf32>
    tpu.vector_store %arg3[%c0_3, %c0_4], %2 {strides = array<i32>} : memref<32x8xf32, #tpu.memory_space<vmem>>, vector<32x8xf32>,
    return
  }
  func.func @transform_0(%arg0: i32) -> (i32, i32) {
    %c0_i32 = arith.constant 0 : i32
    %c0_i32_0 = arith.constant 0 : i32
    return %arg0, %c0_i32 : i32, i32
  }
  func.func @transform_1(%arg0: i32) -> (i32, i32) {
    %c0_i32 = arith.constant 0 : i32
    %c0_i32_0 = arith.constant 0 : i32
    %c0_i32_1 = arith.constant 0 : i32
    return %c0_i32, %c0_i32_0 : i32, i32
  }
  func.func @transform_2(%arg0: i32) -> (i32, i32) {
    %c0_i32 = arith.constant 0 : i32
    %c0_i32_0 = arith.constant 0 : i32
    return %arg0, %c0_i32 : i32, i32
  }
}

</mosaic_0001>

<bundles_post_ra>
// kernel: solve_forward.1
= control target key start
LH: loop header
LB: loop body
LE: loop exit
PB: predicated region body
PF: predicated region fallthrough
CT: control target
= control target key end

     0   :  { %vm19_vm0 = vcmask 261120   ;;  %vm117_vm1 = vcmask 64512   ;;  %s219_s1 = inlined_call_operand.vmem [shape: f32[32,8], index: 1, kind: input, shape index: {}]   ;;  %s220_s0 = inlined_call_operand.vmem [shape: f32[32,32], index: 0, kind: input, shape index: {}]   ;;  %s221_s2 = inlined_call_operand.vmem [shape: f32[32,8], index: 2, kind: output, shape index: {}]  }
   0x1   :  { %v15_v0 = vld [vmem:[%s219_s1] sm:$0xff]  ;;  %v16_v1 = vld [vmem:[%s219_s1 + $0x8] sm:$0xff]  ;;  %v17_v2 = vld [vmem:[%s219_s1 + $0x10] sm:$0xff] }
   0x2   :  { %v152_v3 = vpack.c.bf16 %v16_v1, %v15_v0  ;;  %v18_v4 = vld [vmem:[%s219_s1 + $0x18] sm:$0xff]  ;;  %v11_v5 = vld [vmem:[%s220_s0] sm:$0xff]  ;;  %v13_v6 = vld [vmem:[%s220_s0 + $0x10] sm:$0xff] }
   0x3   :  { %v156_v7 = vpack.c.bf16 %v18_v4, %v17_v2  ;;  %146 = vmatprep.mubr.msk.f32.mxu0 %vm19_vm0, %v11_v5  ;;  %149 = vmatprep.mubr.msk.f32.mxu1 %vm19_vm0, %v13_v6  ;;  %v12_v8 = vld [vmem:[%s220_s0 + $0x8] sm:$0xff]  ;;  %v14_v9 = vld [vmem:[%s220_s0 + $0x18] sm:$0xff] }
   0x4   :  { %153 = vmatprep.subr.bf16.mxu0 %v152_v3  ;;  %160 = vmatprep.subr.bf16.mxu1 %v152_v3 }
   0x5   :  { %155 = vmatpush3.bf16.msra.mxu0 %v152_v3  ;;  %162 = vmatpush3.bf16.msra.mxu1 %v152_v3 }
   0x6   :  { %157 = vmatprep.subr.bf16.mxu0 %v156_v7  ;;  %161 = vmatprep.subr.bf16.mxu1 %v156_v7 }
   0x9   :  { %159 = vmatpush3.bf16.msra.mxu0 %v156_v7  ;;  %163 = vmatpush3.bf16.msra.mxu1 %v156_v7 }
   0xc   :  { %147 = vmatmul.mubr.msk.f32.vlgmr.msra.gmra.mrb[0].mxu0 %vm19_vm0, %v12_v8  ;;  %150 = vmatmul.mubr.msk.f32.vlgmr.msra.gmra.mrb[0].mxu1 %vm19_vm0, %v14_v9 }
  0xdf   :  { %v148_v10 = vpop.f32.mrb[0].mxu0  ;;  %v151_v11 = vpop.f32.mrb[0].mxu1 }
  0xe0   :  { %119 = vst.msk [vmem:[%s221_s2 + $0x8] sm:$0xff] %vm117_vm1, %v148_v10  ;;  %121 = vst.msk [vmem:[%s221_s2 + $0x18] sm:$0xff] %vm117_vm1, %v151_v11  ;;  %v98_v12 = vpop.f32.mrb[1].mxu0  ;;  %v108_v13 = vpop.f32.mrb[1].mxu1 }
  0xe1   :  { %118 = vst.msk [vmem:[%s221_s2] sm:$0xff] %vm117_vm1, %v98_v12  ;;  %120 = vst.msk [vmem:[%s221_s2 + $0x10] sm:$0xff] %vm117_vm1, %v108_v13 }

</bundles_post_ra>
